<compile_context>
chip_gen: v5e
topology: v5e:2x2
jax: 0.10.0
libtpu: 0.0.40
codegen_flags: <defaults>
</compile_context>

<pallas_src>
import functools
import math

import jax
import jax.numpy as jnp
from jax.experimental import pallas as pl
from jax.experimental.pallas import tpu as pltpu


# ------------------------- fused Pallas kernel -------------------------

def _fused_attn_kernel(x_ref, wqkv_ref, bqkv_ref, qw_ref, kw_ref,
                       wout_ref, bout_ref, o_ref, *, n_heads):
    # x_ref block: [1, N, D];  wqkv: [3D, D] (torch layout);  bqkv: [1, 3D]
    # qw/kw: [1, d_head];      wout: [D, D];                  bout: [1, D]
    x = x_ref[0]                         # [N, D]
    N, D = x.shape
    d = D // n_heads

    # ---- qkv projection: x @ W_qkv^T + b  (trans_b handled by the MXU) ----
    qkv = jax.lax.dot_general(
        x, wqkv_ref[...], (((1,), (1,)), ((), ())),
        preferred_element_type=jnp.float32,
    ) + bqkv_ref[...]                    # [N, 3D]

    eps = jnp.finfo(jnp.float32).eps
    scale = 1.0 / math.sqrt(d)           # SDPA scale, folded into q's norm factor
    qw = qw_ref[...]                     # [1, d]
    kw = kw_ref[...]                     # [1, d]

    # ---- per-head QKNorm + attention; heads are static lane slices ----
    head_outs = []
    for h in range(n_heads):
        q_h = qkv[:, h * d:(h + 1) * d]                    # [N, d]
        k_h = qkv[:, D + h * d:D + (h + 1) * d]            # [N, d]
        v_h = qkv[:, 2 * D + h * d:2 * D + (h + 1) * d]    # [N, d]

        # QKNorm == torch nn.RMSNorm over head dim (eps = f32 machine eps),
        # with the 1/sqrt(d) attention scale fused into q's [N, 1] factor.
        q_h = q_h * (jax.lax.rsqrt(jnp.mean(q_h * q_h, -1, keepdims=True) + eps)
                     * scale) * qw
        k_h = k_h * jax.lax.rsqrt(jnp.mean(k_h * k_h, -1, keepdims=True) + eps) * kw

        # scores = q @ k^T (scale already folded into q)
        s = jax.lax.dot_general(
            q_h, k_h, (((1,), (1,)), ((), ())),
            preferred_element_type=jnp.float32,
        )                                                   # [N, N]
        s = s - jnp.max(s, axis=-1, keepdims=True)
        p = jnp.exp(s)
        denom = jnp.sum(p, axis=-1, keepdims=True)          # [N, 1]

        o_h = jnp.dot(p, v_h, preferred_element_type=jnp.float32)   # [N, d]
        # softmax normalization after the PV matmul: [N, d] mul on the EUP path
        head_outs.append(o_h * pl.reciprocal(denom, approx=True))

    # 'b h n d -> b n (h d)' for free: concatenate heads along lanes.
    o = jnp.concatenate(head_outs, axis=-1)                 # [N, D], lane-dense

    # ---- output projection: o @ W_out^T + b ----
    out = jax.lax.dot_general(
        o, wout_ref[...], (((1,), (1,)), ((), ())),
        preferred_element_type=jnp.float32,
    ) + bout_ref[...]                                       # [N, D]

    o_ref[0] = out                                          # lane-dense store


# ------------------------- forward pass wrapper -------------------------

def attn_forward(x, params, n_heads):
    B, N, D = x.shape
    d_head = D // n_heads

    kernel = functools.partial(_fused_attn_kernel, n_heads=n_heads)

    return pl.pallas_call(
        kernel,
        out_shape=jax.ShapeDtypeStruct((B, N, D), jnp.float32),
        grid=(B,),
        in_specs=[
            pl.BlockSpec((1, N, D), lambda b: (b, 0, 0)),          # x
            pl.BlockSpec((3 * D, D), lambda b: (0, 0)),            # W_qkv (resident)
            pl.BlockSpec((1, 3 * D), lambda b: (0, 0)),            # b_qkv
            pl.BlockSpec((1, d_head), lambda b: (0, 0)),           # q_norm weight
            pl.BlockSpec((1, d_head), lambda b: (0, 0)),           # k_norm weight
            pl.BlockSpec((D, D), lambda b: (0, 0)),                # W_out (resident)
            pl.BlockSpec((1, D), lambda b: (0, 0)),                # b_out
        ],
        out_specs=pl.BlockSpec((1, N, D), lambda b: (b, 0, 0)),
        compiler_params=pltpu.CompilerParams(
            dimension_semantics=("parallel",),
        ),
    )(
        x,
        params["w_qkv"],
        params["b_qkv"].reshape(1, 3 * D),
        params["q_norm_w"].reshape(1, d_head),
        params["k_norm_w"].reshape(1, d_head),
        params["w_out"],
        params["b_out"].reshape(1, D),
    )


# ------------------------- reference (pure JAX) -------------------------

def reference_forward(x, params, n_heads):
    B, N, D = x.shape
    d_head = D // n_heads
    qkv = x.reshape(B * N, D) @ params["w_qkv"].T + params["b_qkv"]
    qkv = qkv.reshape(B, N, 3, n_heads, d_head)
    qkv = jnp.transpose(qkv, (2, 0, 3, 1, 4))
    q, k, v = qkv[0], qkv[1], qkv[2]
    eps = jnp.finfo(jnp.float32).eps
    q = q * jax.lax.rsqrt(jnp.mean(q * q, -1, keepdims=True) + eps) * params["q_norm_w"]
    k = k * jax.lax.rsqrt(jnp.mean(k * k, -1, keepdims=True) + eps) * params["k_norm_w"]
    s = jnp.einsum("bhqd,bhkd->bhqk", q, k) / math.sqrt(d_head)
    p = jax.nn.softmax(s, axis=-1)
    o = jnp.einsum("bhqk,bhkd->bhqd", p, v)
    o = jnp.transpose(o, (0, 2, 1, 3)).reshape(B * N, D)
    out = o @ params["w_out"].T + params["b_out"]
    return out.reshape(B, N, D)


# ------------------------- main -------------------------

if __name__ == "__main__":
    B, N, D, H = 2, 8, 32, 4   # batch, seq, d_model, n_heads
    d_head = D // H

    key = jax.random.PRNGKey(0)
    kx, k1, k2, k3, k4 = jax.random.split(key, 5)

    x = jax.random.normal(kx, (B, N, D), dtype=jnp.float32)

    # Deterministic parameter init (torch layout: Linear weight is [out, in]).
    params = {
        "w_qkv": 0.05 * jax.random.normal(k1, (3 * D, D), dtype=jnp.float32),
        "b_qkv": 0.01 * jax.random.normal(k2, (3 * D,), dtype=jnp.float32),
        "w_out": 0.05 * jax.random.normal(k3, (D, D), dtype=jnp.float32),
        "b_out": 0.01 * jax.random.normal(k4, (D,), dtype=jnp.float32),
        # nn.RMSNorm weights initialize to ones
        "q_norm_w": jnp.ones((d_head,), dtype=jnp.float32),
        "k_norm_w": jnp.ones((d_head,), dtype=jnp.float32),
    }

    out = attn_forward(x, params, H)
    out = jax.block_until_ready(out)

    ref = reference_forward(x, params, H)
    assert out.shape == (B, N, D)
    # slightly looser tolerance: softmax denom uses EUP approx reciprocal
    assert jnp.allclose(out, ref, atol=1e-3, rtol=1e-3), "mismatch vs reference"

    print("KERNEL_OK")
</pallas_src>

<mosaic_0001>
module attributes {stable_mosaic.version = 11 : i64} {
  func.func @_fused_attn_kernel(%arg0: i32, %arg1: memref<1x8x32xf32, #tpu.memory_space<vmem>>, %arg2: memref<96x32xf32, #tpu.memory_space<vmem>>, %arg3: memref<1x96xf32, #tpu.memory_space<vmem>>, %arg4: memref<1x8xf32, #tpu.memory_space<vmem>>, %arg5: memref<1x8xf32, #tpu.memory_space<vmem>>, %arg6: memref<32x32xf32, #tpu.memory_space<vmem>>, %arg7: memref<1x32xf32, #tpu.memory_space<vmem>>, %arg8: memref<1x8x32xf32, #tpu.memory_space<vmem>>) attributes {dimension_semantics = [#tpu.dimension_semantics<parallel>], iteration_bounds = array<i64: 2>, scalar_prefetch = 0 : i64, scratch_operands = 0 : i64, tpu.core_type = #tpu.core_type<tc>, window_params = [{transform_indices = @transform_0, window_bounds = array<i64: 1, 8, 32>}, {pipeline_mode = #tpu.pipeline_mode<synchronous>, transform_indices = @transform_1, window_bounds = array<i64: 96, 32>}, {pipeline_mode = #tpu.pipeline_mode<synchronous>, transform_indices = @transform_2, window_bounds = array<i64: 1, 96>}, {pipeline_mode = #tpu.pipeline_mode<synchronous>, transform_indices = @transform_3, window_bounds = array<i64: 1, 8>}, {pipeline_mode = #tpu.pipeline_mode<synchronous>, transform_indices = @transform_4, window_bounds = array<i64: 1, 8>}, {pipeline_mode = #tpu.pipeline_mode<synchronous>, transform_indices = @transform_5, window_bounds = array<i64: 32, 32>}, {pipeline_mode = #tpu.pipeline_mode<synchronous>, transform_indices = @transform_6, window_bounds = array<i64: 1, 32>}, {transform_indices = @transform_7, window_bounds = array<i64: 1, 8, 32>}]} {
    %c0 = arith.constant 0 : index
    %c0_0 = arith.constant 0 : index
    %c0_1 = arith.constant 0 : index
    %0 = vector.load %arg1[%c0, %c0_0, %c0_1] : memref<1x8x32xf32, #tpu.memory_space<vmem>>, vector<1x8x32xf32>
    %1 = vector.shape_cast %0 : vector<1x8x32xf32> to vector<8x32xf32>
    %c0_2 = arith.constant 0 : index
    %c0_3 = arith.constant 0 : index
    %2 = vector.load %arg2[%c0_2, %c0_3] : memref<96x32xf32, #tpu.memory_space<vmem>>, vector<96x32xf32>
    %cst = arith.constant dense<0.000000e+00> : vector<8x96xf32>
    %3 = tpu.matmul %1, %2, %cst {dimension_numbers = #tpu.dot_dimension_numbers<[1], [1], [0], [0], [0, 0, 1, 0], [], []>} : vector<8x32xf32>, vector<96x32xf32>, vector<8x96xf32> -> vector<8x96xf32>
    %c0_4 = arith.constant 0 : index
    %c0_5 = arith.constant 0 : index
    %4 = vector.load %arg3[%c0_4, %c0_5] : memref<1x96xf32, #tpu.memory_space<vmem>>, vector<1x96xf32>
    %5 = vector.broadcast %4 : vector<1x96xf32> to vector<8x96xf32>
    %6 = arith.addf %3, %5 : vector<8x96xf32>
    %c0_6 = arith.constant 0 : index
    %c0_7 = arith.constant 0 : index
    %7 = vector.load %arg4[%c0_6, %c0_7] : memref<1x8xf32, #tpu.memory_space<vmem>>, vector<1x8xf32>
    %c0_8 = arith.constant 0 : index
    %c0_9 = arith.constant 0 : index
    %8 = vector.load %arg5[%c0_8, %c0_9] : memref<1x8xf32, #tpu.memory_space<vmem>>, vector<1x8xf32>
    %9 = vector.extract_strided_slice %6 {offsets = [0, 0], sizes = [8, 8], strides = [1, 1]} : vector<8x96xf32> to vector<8x8xf32>
    %10 = vector.extract_strided_slice %6 {offsets = [0, 32], sizes = [8, 8], strides = [1, 1]} : vector<8x96xf32> to vector<8x8xf32>
    %11 = vector.extract_strided_slice %6 {offsets = [0, 64], sizes = [8, 8], strides = [1, 1]} : vector<8x96xf32> to vector<8x8xf32>
    %12 = arith.mulf %9, %9 : vector<8x8xf32>
    %cst_10 = arith.constant dense<0.000000e+00> : vector<8xf32>
    %13 = vector.multi_reduction <add>, %12, %cst_10 [1] : vector<8x8xf32> to vector<8xf32>
    %14 = vector.shape_cast %13 : vector<8xf32> to vector<8x1xf32>
    %cst_11 = arith.constant 8.000000e+00 : f32
    %15 = vector.broadcast %cst_11 : f32 to vector<8x1xf32>
    %16 = arith.divf %14, %15 : vector<8x1xf32>
    %cst_12 = arith.constant 1.1920929E-7 : f32
    %17 = vector.broadcast %cst_12 : f32 to vector<8x1xf32>
    %18 = arith.addf %16, %17 : vector<8x1xf32>
    %19 = math.rsqrt %18 : vector<8x1xf32>
    %cst_13 = arith.constant 0.353553385 : f32
    %20 = vector.broadcast %cst_13 : f32 to vector<8x1xf32>
    %21 = arith.mulf %19, %20 : vector<8x1xf32>
    %22 = vector.broadcast %21 : vector<8x1xf32> to vector<8x8xf32>
    %23 = arith.mulf %9, %22 : vector<8x8xf32>
    %24 = vector.broadcast %7 : vector<1x8xf32> to vector<8x8xf32>
    %25 = arith.mulf %23, %24 : vector<8x8xf32>
    %26 = arith.mulf %10, %10 : vector<8x8xf32>
    %cst_14 = arith.constant dense<0.000000e+00> : vector<8xf32>
    %27 = vector.multi_reduction <add>, %26, %cst_14 [1] : vector<8x8xf32> to vector<8xf32>
    %28 = vector.shape_cast %27 : vector<8xf32> to vector<8x1xf32>
    %cst_15 = arith.constant 8.000000e+00 : f32
    %29 = vector.broadcast %cst_15 : f32 to vector<8x1xf32>
    %30 = arith.divf %28, %29 : vector<8x1xf32>
    %cst_16 = arith.constant 1.1920929E-7 : f32
    %31 = vector.broadcast %cst_16 : f32 to vector<8x1xf32>
    %32 = arith.addf %30, %31 : vector<8x1xf32>
    %33 = math.rsqrt %32 : vector<8x1xf32>
    %34 = vector.broadcast %33 : vector<8x1xf32> to vector<8x8xf32>
    %35 = arith.mulf %10, %34 : vector<8x8xf32>
    %36 = vector.broadcast %8 : vector<1x8xf32> to vector<8x8xf32>
    %37 = arith.mulf %35, %36 : vector<8x8xf32>
    %cst_17 = arith.constant dense<0.000000e+00> : vector<8x8xf32>
    %38 = tpu.matmul %25, %37, %cst_17 {dimension_numbers = #tpu.dot_dimension_numbers<[1], [1], [0], [0], [0, 0, 1, 0], [], []>} : vector<8x8xf32>, vector<8x8xf32>, vector<8x8xf32> -> vector<8x8xf32>
    %cst_18 = arith.constant dense<0xFF800000> : vector<8xf32>
    %39 = vector.multi_reduction <maximumf>, %38, %cst_18 [1] : vector<8x8xf32> to vector<8xf32>
    %40 = vector.shape_cast %39 : vector<8xf32> to vector<8x1xf32>
    %41 = vector.broadcast %40 : vector<8x1xf32> to vector<8x8xf32>
    %42 = arith.subf %38, %41 : vector<8x8xf32>
    %43 = math.exp %42 : vector<8x8xf32>
    %cst_19 = arith.constant dense<0.000000e+00> : vector<8xf32>
    %44 = vector.multi_reduction <add>, %43, %cst_19 [1] : vector<8x8xf32> to vector<8xf32>
    %45 = vector.shape_cast %44 : vector<8xf32> to vector<8x1xf32>
    %cst_20 = arith.constant dense<0.000000e+00> : vector<8x8xf32>
    %46 = tpu.matmul %43, %11, %cst_20 {dimension_numbers = #tpu.dot_dimension_numbers<[1], [0], [0], [1], [0, 0, 1, 1], [], []>} : vector<8x8xf32>, vector<8x8xf32>, vector<8x8xf32> -> vector<8x8xf32>
    %47 = tpu.reciprocal %45 {approx = true} : vector<8x1xf32> -> vector<8x1xf32>
    %48 = vector.broadcast %47 : vector<8x1xf32> to vector<8x8xf32>
    %49 = arith.mulf %46, %48 : vector<8x8xf32>
    %50 = vector.extract_strided_slice %6 {offsets = [0, 8], sizes = [8, 8], strides = [1, 1]} : vector<8x96xf32> to vector<8x8xf32>
    %51 = vector.extract_strided_slice %6 {offsets = [0, 40], sizes = [8, 8], strides = [1, 1]} : vector<8x96xf32> to vector<8x8xf32>
    %52 = vector.extract_strided_slice %6 {offsets = [0, 72], sizes = [8, 8], strides = [1, 1]} : vector<8x96xf32> to vector<8x8xf32>
    %53 = arith.mulf %50, %50 : vector<8x8xf32>
    %cst_21 = arith.constant dense<0.000000e+00> : vector<8xf32>
    %54 = vector.multi_reduction <add>, %53, %cst_21 [1] : vector<8x8xf32> to vector<8xf32>
    %55 = vector.shape_cast %54 : vector<8xf32> to vector<8x1xf32>
    %cst_22 = arith.constant 8.000000e+00 : f32
    %56 = vector.broadcast %cst_22 : f32 to vector<8x1xf32>
    %57 = arith.divf %55, %56 : vector<8x1xf32>
    %cst_23 = arith.constant 1.1920929E-7 : f32
    %58 = vector.broadcast %cst_23 : f32 to vector<8x1xf32>
    %59 = arith.addf %57, %58 : vector<8x1xf32>
    %60 = math.rsqrt %59 : vector<8x1xf32>
    %cst_24 = arith.constant 0.353553385 : f32
    %61 = vector.broadcast %cst_24 : f32 to vector<8x1xf32>
    %62 = arith.mulf %60, %61 : vector<8x1xf32>
    %63 = vector.broadcast %62 : vector<8x1xf32> to vector<8x8xf32>
    %64 = arith.mulf %50, %63 : vector<8x8xf32>
    %65 = vector.broadcast %7 : vector<1x8xf32> to vector<8x8xf32>
    %66 = arith.mulf %64, %65 : vector<8x8xf32>
    %67 = arith.mulf %51, %51 : vector<8x8xf32>
    %cst_25 = arith.constant dense<0.000000e+00> : vector<8xf32>
    %68 = vector.multi_reduction <add>, %67, %cst_25 [1] : vector<8x8xf32> to vector<8xf32>
    %69 = vector.shape_cast %68 : vector<8xf32> to vector<8x1xf32>
    %cst_26 = arith.constant 8.000000e+00 : f32
    %70 = vector.broadcast %cst_26 : f32 to vector<8x1xf32>
    %71 = arith.divf %69, %70 : vector<8x1xf32>
    %cst_27 = arith.constant 1.1920929E-7 : f32
    %72 = vector.broadcast %cst_27 : f32 to vector<8x1xf32>
    %73 = arith.addf %71, %72 : vector<8x1xf32>
    %74 = math.rsqrt %73 : vector<8x1xf32>
    %75 = vector.broadcast %74 : vector<8x1xf32> to vector<8x8xf32>
    %76 = arith.mulf %51, %75 : vector<8x8xf32>
    %77 = vector.broadcast %8 : vector<1x8xf32> to vector<8x8xf32>
    %78 = arith.mulf %76, %77 : vector<8x8xf32>
    %cst_28 = arith.constant dense<0.000000e+00> : vector<8x8xf32>
    %79 = tpu.matmul %66, %78, %cst_28 {dimension_numbers = #tpu.dot_dimension_numbers<[1], [1], [0], [0], [0, 0, 1, 0], [], []>} : vector<8x8xf32>, vector<8x8xf32>, vector<8x8xf32> -> vector<8x8xf32>
    %cst_29 = arith.constant dense<0xFF800000> : vector<8xf32>
    %80 = vector.multi_reduction <maximumf>, %79, %cst_29 [1] : vector<8x8xf32> to vector<8xf32>
    %81 = vector.shape_cast %80 : vector<8xf32> to vector<8x1xf32>
    %82 = vector.broadcast %81 : vector<8x1xf32> to vector<8x8xf32>
    %83 = arith.subf %79, %82 : vector<8x8xf32>
    %84 = math.exp %83 : vector<8x8xf32>
    %cst_30 = arith.constant dense<0.000000e+00> : vector<8xf32>
    %85 = vector.multi_reduction <add>, %84, %cst_30 [1] : vector<8x8xf32> to vector<8xf32>
    %86 = vector.shape_cast %85 : vector<8xf32> to vector<8x1xf32>
    %cst_31 = arith.constant dense<0.000000e+00> : vector<8x8xf32>
    %87 = tpu.matmul %84, %52, %cst_31 {dimension_numbers = #tpu.dot_dimension_numbers<[1], [0], [0], [1], [0, 0, 1, 1], [], []>} : vector<8x8xf32>, vector<8x8xf32>, vector<8x8xf32> -> vector<8x8xf32>
    %88 = tpu.reciprocal %86 {approx = true} : vector<8x1xf32> -> vector<8x1xf32>
    %89 = vector.broadcast %88 : vector<8x1xf32> to vector<8x8xf32>
    %90 = arith.mulf %87, %89 : vector<8x8xf32>
    %91 = vector.extract_strided_slice %6 {offsets = [0, 16], sizes = [8, 8], strides = [1, 1]} : vector<8x96xf32> to vector<8x8xf32>
    %92 = vector.extract_strided_slice %6 {offsets = [0, 48], sizes = [8, 8], strides = [1, 1]} : vector<8x96xf32> to vector<8x8xf32>
    %93 = vector.extract_strided_slice %6 {offsets = [0, 80], sizes = [8, 8], strides = [1, 1]} : vector<8x96xf32> to vector<8x8xf32>
    %94 = arith.mulf %91, %91 : vector<8x8xf32>
    %cst_32 = arith.constant dense<0.000000e+00> : vector<8xf32>
    %95 = vector.multi_reduction <add>, %94, %cst_32 [1] : vector<8x8xf32> to vector<8xf32>
    %96 = vector.shape_cast %95 : vector<8xf32> to vector<8x1xf32>
    %cst_33 = arith.constant 8.000000e+00 : f32
    %97 = vector.broadcast %cst_33 : f32 to vector<8x1xf32>
    %98 = arith.divf %96, %97 : vector<8x1xf32>
    %cst_34 = arith.constant 1.1920929E-7 : f32
    %99 = vector.broadcast %cst_34 : f32 to vector<8x1xf32>
    %100 = arith.addf %98, %99 : vector<8x1xf32>
    %101 = math.rsqrt %100 : vector<8x1xf32>
    %cst_35 = arith.constant 0.353553385 : f32
    %102 = vector.broadcast %cst_35 : f32 to vector<8x1xf32>
    %103 = arith.mulf %101, %102 : vector<8x1xf32>
    %104 = vector.broadcast %103 : vector<8x1xf32> to vector<8x8xf32>
    %105 = arith.mulf %91, %104 : vector<8x8xf32>
    %106 = vector.broadcast %7 : vector<1x8xf32> to vector<8x8xf32>
    %107 = arith.mulf %105, %106 : vector<8x8xf32>
    %108 = arith.mulf %92, %92 : vector<8x8xf32>
    %cst_36 = arith.constant dense<0.000000e+00> : vector<8xf32>
    %109 = vector.multi_reduction <add>, %108, %cst_36 [1] : vector<8x8xf32> to vector<8xf32>
    %110 = vector.shape_cast %109 : vector<8xf32> to vector<8x1xf32>
    %cst_37 = arith.constant 8.000000e+00 : f32
    %111 = vector.broadcast %cst_37 : f32 to vector<8x1xf32>
    %112 = arith.divf %110, %111 : vector<8x1xf32>
    %cst_38 = arith.constant 1.1920929E-7 : f32
    %113 = vector.broadcast %cst_38 : f32 to vector<8x1xf32>
    %114 = arith.addf %112, %113 : vector<8x1xf32>
    %115 = math.rsqrt %114 : vector<8x1xf32>
    %116 = vector.broadcast %115 : vector<8x1xf32> to vector<8x8xf32>
    %117 = arith.mulf %92, %116 : vector<8x8xf32>
    %118 = vector.broadcast %8 : vector<1x8xf32> to vector<8x8xf32>
    %119 = arith.mulf %117, %118 : vector<8x8xf32>
    %cst_39 = arith.constant dense<0.000000e+00> : vector<8x8xf32>
    %120 = tpu.matmul %107, %119, %cst_39 {dimension_numbers = #tpu.dot_dimension_numbers<[1], [1], [0], [0], [0, 0, 1, 0], [], []>} : vector<8x8xf32>, vector<8x8xf32>, vector<8x8xf32> -> vector<8x8xf32>
    %cst_40 = arith.constant dense<0xFF800000> : vector<8xf32>
    %121 = vector.multi_reduction <maximumf>, %120, %cst_40 [1] : vector<8x8xf32> to vector<8xf32>
    %122 = vector.shape_cast %121 : vector<8xf32> to vector<8x1xf32>
    %123 = vector.broadcast %122 : vector<8x1xf32> to vector<8x8xf32>
    %124 = arith.subf %120, %123 : vector<8x8xf32>
    %125 = math.exp %124 : vector<8x8xf32>
    %cst_41 = arith.constant dense<0.000000e+00> : vector<8xf32>
    %126 = vector.multi_reduction <add>, %125, %cst_41 [1] : vector<8x8xf32> to vector<8xf32>
    %127 = vector.shape_cast %126 : vector<8xf32> to vector<8x1xf32>
    %cst_42 = arith.constant dense<0.000000e+00> : vector<8x8xf32>
    %128 = tpu.matmul %125, %93, %cst_42 {dimension_numbers = #tpu.dot_dimension_numbers<[1], [0], [0], [1], [0, 0, 1, 1], [], []>} : vector<8x8xf32>, vector<8x8xf32>, vector<8x8xf32> -> vector<8x8xf32>
    %129 = tpu.reciprocal %127 {approx = true} : vector<8x1xf32> -> vector<8x1xf32>
    %130 = vector.broadcast %129 : vector<8x1xf32> to vector<8x8xf32>
    %131 = arith.mulf %128, %130 : vector<8x8xf32>
    %132 = vector.extract_strided_slice %6 {offsets = [0, 24], sizes = [8, 8], strides = [1, 1]} : vector<8x96xf32> to vector<8x8xf32>
    %133 = vector.extract_strided_slice %6 {offsets = [0, 56], sizes = [8, 8], strides = [1, 1]} : vector<8x96xf32> to vector<8x8xf32>
    %134 = vector.extract_strided_slice %6 {offsets = [0, 88], sizes = [8, 8], strides = [1, 1]} : vector<8x96xf32> to vector<8x8xf32>
    %135 = arith.mulf %132, %132 : vector<8x8xf32>
    %cst_43 = arith.constant dense<0.000000e+00> : vector<8xf32>
    %136 = vector.multi_reduction <add>, %135, %cst_43 [1] : vector<8x8xf32> to vector<8xf32>
    %137 = vector.shape_cast %136 : vector<8xf32> to vector<8x1xf32>
    %cst_44 = arith.constant 8.000000e+00 : f32
    %138 = vector.broadcast %cst_44 : f32 to vector<8x1xf32>
    %139 = arith.divf %137, %138 : vector<8x1xf32>
    %cst_45 = arith.constant 1.1920929E-7 : f32
    %140 = vector.broadcast %cst_45 : f32 to vector<8x1xf32>
    %141 = arith.addf %139, %140 : vector<8x1xf32>
    %142 = math.rsqrt %141 : vector<8x1xf32>
    %cst_46 = arith.constant 0.353553385 : f32
    %143 = vector.broadcast %cst_46 : f32 to vector<8x1xf32>
    %144 = arith.mulf %142, %143 : vector<8x1xf32>
    %145 = vector.broadcast %144 : vector<8x1xf32> to vector<8x8xf32>
    %146 = arith.mulf %132, %145 : vector<8x8xf32>
    %147 = vector.broadcast %7 : vector<1x8xf32> to vector<8x8xf32>
    %148 = arith.mulf %146, %147 : vector<8x8xf32>
    %149 = arith.mulf %133, %133 : vector<8x8xf32>
    %cst_47 = arith.constant dense<0.000000e+00> : vector<8xf32>
    %150 = vector.multi_reduction <add>, %149, %cst_47 [1] : vector<8x8xf32> to vector<8xf32>
    %151 = vector.shape_cast %150 : vector<8xf32> to vector<8x1xf32>
    %cst_48 = arith.constant 8.000000e+00 : f32
    %152 = vector.broadcast %cst_48 : f32 to vector<8x1xf32>
    %153 = arith.divf %151, %152 : vector<8x1xf32>
    %cst_49 = arith.constant 1.1920929E-7 : f32
    %154 = vector.broadcast %cst_49 : f32 to vector<8x1xf32>
    %155 = arith.addf %153, %154 : vector<8x1xf32>
    %156 = math.rsqrt %155 : vector<8x1xf32>
    %157 = vector.broadcast %156 : vector<8x1xf32> to vector<8x8xf32>
    %158 = arith.mulf %133, %157 : vector<8x8xf32>
    %159 = vector.broadcast %8 : vector<1x8xf32> to vector<8x8xf32>
    %160 = arith.mulf %158, %159 : vector<8x8xf32>
    %cst_50 = arith.constant dense<0.000000e+00> : vector<8x8xf32>
    %161 = tpu.matmul %148, %160, %cst_50 {dimension_numbers = #tpu.dot_dimension_numbers<[1], [1], [0], [0], [0, 0, 1, 0], [], []>} : vector<8x8xf32>, vector<8x8xf32>, vector<8x8xf32> -> vector<8x8xf32>
    %cst_51 = arith.constant dense<0xFF800000> : vector<8xf32>
    %162 = vector.multi_reduction <maximumf>, %161, %cst_51 [1] : vector<8x8xf32> to vector<8xf32>
    %163 = vector.shape_cast %162 : vector<8xf32> to vector<8x1xf32>
    %164 = vector.broadcast %163 : vector<8x1xf32> to vector<8x8xf32>
    %165 = arith.subf %161, %164 : vector<8x8xf32>
    %166 = math.exp %165 : vector<8x8xf32>
    %cst_52 = arith.constant dense<0.000000e+00> : vector<8xf32>
    %167 = vector.multi_reduction <add>, %166, %cst_52 [1] : vector<8x8xf32> to vector<8xf32>
    %168 = vector.shape_cast %167 : vector<8xf32> to vector<8x1xf32>
    %cst_53 = arith.constant dense<0.000000e+00> : vector<8x8xf32>
    %169 = tpu.matmul %166, %134, %cst_53 {dimension_numbers = #tpu.dot_dimension_numbers<[1], [0], [0], [1], [0, 0, 1, 1], [], []>} : vector<8x8xf32>, vector<8x8xf32>, vector<8x8xf32> -> vector<8x8xf32>
    %170 = tpu.reciprocal %168 {approx = true} : vector<8x1xf32> -> vector<8x1xf32>
    %171 = vector.broadcast %170 : vector<8x1xf32> to vector<8x8xf32>
    %172 = arith.mulf %169, %171 : vector<8x8xf32>
    %173 = tpu.concatenate %49, %90, %131, %172 in 1 : vector<8x8xf32>, vector<8x8xf32>, vector<8x8xf32>, vector<8x8xf32> -> vector<8x32xf32>
    %c0_54 = arith.constant 0 : index
    %c0_55 = arith.constant 0 : index
    %174 = vector.load %arg6[%c0_54, %c0_55] : memref<32x32xf32, #tpu.memory_space<vmem>>, vector<32x32xf32>
    %cst_56 = arith.constant dense<0.000000e+00> : vector<8x32xf32>
    %175 = tpu.matmul %173, %174, %cst_56 {dimension_numbers = #tpu.dot_dimension_numbers<[1], [1], [0], [0], [0, 0, 1, 0], [], []>} : vector<8x32xf32>, vector<32x32xf32>, vector<8x32xf32> -> vector<8x32xf32>
    %c0_57 = arith.constant 0 : index
    %c0_58 = arith.constant 0 : index
    %176 = vector.load %arg7[%c0_57, %c0_58] : memref<1x32xf32, #tpu.memory_space<vmem>>, vector<1x32xf32>
    %177 = vector.broadcast %176 : vector<1x32xf32> to vector<8x32xf32>
    %178 = arith.addf %175, %177 : vector<8x32xf32>
    %c0_59 = arith.constant 0 : index
    %c0_60 = arith.constant 0 : index
    %c0_61 = arith.constant 0 : index
    %179 = vector.load %arg8[%c0_59, %c0_60, %c0_61] : memref<1x8x32xf32, #tpu.memory_space<vmem>>, vector<1x8x32xf32>
    %180 = vector.shape_cast %179 : vector<1x8x32xf32> to vector<8x32xf32>
    %181 = vector.shape_cast %178 : vector<8x32xf32> to vector<1x8x32xf32>
    tpu.vector_store %arg8[%c0_59, %c0_60, %c0_61], %181 {strides = array<i32>} : memref<1x8x32xf32, #tpu.memory_space<vmem>>, vector<1x8x32xf32>,
    return
  }
  func.func @transform_0(%arg0: i32) -> (i32, i32, i32) {
    %c0_i32 = arith.constant 0 : i32
    %c0_i32_0 = arith.constant 0 : i32
    %c0_i32_1 = arith.constant 0 : i32
    return %arg0, %c0_i32, %c0_i32_0 : i32, i32, i32
  }
  func.func @transform_1(%arg0: i32) -> (i32, i32) {
    %c0_i32 = arith.constant 0 : i32
    %c0_i32_0 = arith.constant 0 : i32
    %c0_i32_1 = arith.constant 0 : i32
    return %c0_i32, %c0_i32_0 : i32, i32
  }
  func.func @transform_2(%arg0: i32) -> (i32, i32) {
    %c0_i32 = arith.constant 0 : i32
    %c0_i32_0 = arith.constant 0 : i32
    %c0_i32_1 = arith.constant 0 : i32
    return %c0_i32, %c0_i32_0 : i32, i32
  }
  func.func @transform_3(%arg0: i32) -> (i32, i32) {
    %c0_i32 = arith.constant 0 : i32
    %c0_i32_0 = arith.constant 0 : i32
    %c0_i32_1 = arith.constant 0 : i32
    return %c0_i32, %c0_i32_0 : i32, i32
  }
  func.func @transform_4(%arg0: i32) -> (i32, i32) {
    %c0_i32 = arith.constant 0 : i32
    %c0_i32_0 = arith.constant 0 : i32
    %c0_i32_1 = arith.constant 0 : i32
    return %c0_i32, %c0_i32_0 : i32, i32
  }
  func.func @transform_5(%arg0: i32) -> (i32, i32) {
    %c0_i32 = arith.constant 0 : i32
    %c0_i32_0 = arith.constant 0 : i32
    %c0_i32_1 = arith.constant 0 : i32
    return %c0_i32, %c0_i32_0 : i32, i32
  }
  func.func @transform_6(%arg0: i32) -> (i32, i32) {
    %c0_i32 = arith.constant 0 : i32
    %c0_i32_0 = arith.constant 0 : i32
    %c0_i32_1 = arith.constant 0 : i32
    return %c0_i32, %c0_i32_0 : i32, i32
  }
  func.func @transform_7(%arg0: i32) -> (i32, i32, i32) {
    %c0_i32 = arith.constant 0 : i32
    %c0_i32_0 = arith.constant 0 : i32
    %c0_i32_1 = arith.constant 0 : i32
    return %arg0, %c0_i32, %c0_i32_0 : i32, i32, i32
  }
}

</mosaic_0001>

<bundles_post_ra>
// kernel: tpu_custom_call.1
= control target key start
LH: loop header
LB: loop body
LE: loop exit
PB: predicated region body
PF: predicated region fallthrough
CT: control target
= control target key end

     0   :  { %12 = vsyncpa [#allocation3], 0  ;;  %s1475_s0 = inlined_call_operand.vmem [shape: f32[2,8,32], index: 0, kind: input, shape index: {}]   ;;  %s1476_s1 = inlined_call_operand.vmem [shape: f32[96,32], index: 1, kind: input, shape index: {}]   ;;  %s1477_s2 = inlined_call_operand.vmem [shape: f32[1,96], index: 2, kind: input, shape index: {}]   ;;  %s1478_s3 = inlined_call_operand.vmem [shape: f32[1,8], index: 3, kind: input, shape index: {}]   ;;  %s1479_s4 = inlined_call_operand.vmem [shape: f32[1,8], index: 4, kind: input, shape index: {}]   ;;  %s1480_s5 = inlined_call_operand.vmem [shape: f32[32,32], index: 5, kind: input, shape index: {}]   ;;  %s1481_s6 = inlined_call_operand.vmem [shape: f32[1,32], index: 6, kind: input, shape index: {}]   ;;  %s1482_s7 = inlined_call_operand.hbm [shape: f32[2,8,32], index: 7, kind: output, shape index: {}]  }
   0x1   :  { %14 = vsyncpa [#allocation3 + $0x1], 0  ;;  %s1206_s24 = smov 0   ;;  %s1208_s25 = smov 0  }
   0x2   :  { %s1210_s26 = smov 0   ;;  %s1212_s27 = smov 0  }
   0x3 LB: > { %s1227_s28 = sadd.s32 4294967295, %s1148_s27   ;;  %s953_s29 = sadd.s32 4294967294, %s1148_s27   ;;  %s1148_s27 = sphi %s1212_s27, %s1488_s27   ;;  %s1144_s26 = sphi %s1210_s26, %s1487_s26   ;;  %s1140_s25 = sphi %s1208_s25, %s1486_s25   ;;  %s1136_s24 = sphi %s1206_s24, %s1485_s24  }
   0x4   : > { %s1231_s30 = sadd.s32 1, %s1148_s27   ;;  %s179_s8 = sadd.s32 1, %s1144_s26 }
   0x5   : > { %s176_s9 = ssub.s32 %s1148_s27, %s1231_s30  ;;  %p189_p0 = scmp.ne.s32.totalorder %s1144_s26, %s1140_s25 }
   0x6   : > { %p177_p1 = scmp.eq.s32.totalorder %s176_s9, 0  ;;  %p190_p2 = scmp.eq.s32.totalorder %s1227_s28, 1 }
   0x7   : > { %p195_p3 = scmp.ne.s32.totalorder %s1140_s25, %s1136_s24  ;;  %p196_p4 = scmp.eq.s32.totalorder %s953_s29, 1 }
   0x8   : > { %s1242_s10 = scalar_select %p177_p1, %s1144_s26, %s179_s8  }
   0x9   : > { %p1244_p5 = por %p190_p2, %p189_p0  ;;  %p1248_p6 = por %p196_p4, %p195_p3 }
   0xa   : > { %p956_p7 = scmp.ge.s32.totalorder %s1148_s27, 1  ;;  %p239_p8 = scmp.lt.s32.totalorder %s1148_s27, 3 }
   0xc   : > { %p240_p9 = pnand %p956_p7, %p239_p8 }
   0xd   : > { %p270_p10 = scmp.lt.s32.totalorder (!%p240_p9), %s1227_s28, 1  ;;  %s1150_s16 = smov (!%p240_p9), 120  }
   0xe   : > { %243 = sbr.rel (%p240_p9) target bundleno = 1486 (0x5ce), region = 48  ;;  %s1151_s17 = smov (!%p240_p9), 96  }
   0xf   : > { %s1152_s18 = smov (!%p240_p9), 88   ;;  %s1153_s21 = smov (!%p240_p9), 32  }
  0x10   : > { %s1154_s29 = smov (!%p240_p9), 8   ;;  %s1155_s8 = smov (!%p240_p9), 104  }
  0x11   : > { %s1156_s9 = smov (!%p240_p9), 40   ;;  %s1159_s14 = smov (!%p240_p9), 112  }
  0x12   : > { %s1160_s15 = smov (!%p240_p9), 72   ;;  %s1165_s20 = smov (!%p240_p9), 64  }
  0x13   : > { %v286_v0 = vld [vmem:[%s1476_s1 + $0x58] sm:$0xff]  ;;  %vm291_vm0 = vcmask 261120   ;;  %v285_v1 = vld [vmem:[%s1476_s1 + $0x50] sm:$0xff]  ;;  %v284_v2 = vld [vmem:[%s1476_s1 + $0x48] sm:$0xff]  ;;  %s271_s19 = scalar_select %p270_p10, %s1227_s28, 1  ;;  %vm354_vm1 = vcmask 64512  }
  0x14   : > { %959 = vmatpush.xpose.msk.msra.mxu0 %vm291_vm0, %v286_v0  ;;  %v283_v3 = vld [vmem:[%s1476_s1 + $0x40] sm:$0xff]  ;;  %v282_v4 = vld [vmem:[%s1476_s1 + $0x38] sm:$0xff]  ;;  %v281_v5 = vld [vmem:[%s1476_s1 + $0x30] sm:$0xff]  ;;  %v1157_v26 = vmov 8.0  }
  0x15   : > { %v280_v6 = vld [vmem:[%s1476_s1 + $0x28] sm:$0xff]  ;;  %v279_v7 = vld [vmem:[%s1476_s1 + $0x20] sm:$0xff]  ;;  %v278_v8 = vld [vmem:[%s1476_s1 + $0x18] sm:$0xff]  ;;  %s958_s22 = sshll.u32 %s271_s19, 3  ;;  %1052 = vrcp.f32 %v1157_v26  ;;  %s1164_s19 = smov 24  }
  0x16   : > { %v277_v9 = vld [vmem:[%s1476_s1 + $0x10] sm:$0xff]  ;;  %v276_v10 = vld [vmem:[%s1476_s1 + $0x8] sm:$0xff]  ;;  %v275_v11 = vld [vmem:[%s1476_s1] sm:$0xff]  ;;  %s273_s13 = scalar_lea.vmem %s1475_s0, %s958_s22 }
  0x17   : > { %v274_v12 = vld [vmem:[%s273_s13] sm:$0xff]  ;;  %s1158_s13 = smov 80  }
  0x18   : > { %960 = vmatpush.xpose.msk.msra.mxu0 %vm291_vm0, %v285_v1  ;;  %v1048_v13 = vld [vmem:[%s1477_s2] ss:$0 sm:$0xff] }
  0x19   : > { %v1326_v17 = vld [vmem:[%s1479_s4] ss:$0 sm:$0xff] }
  0x1a   : > { %v1332_v18 = vld [vmem:[%s1478_s3] ss:$0 sm:$0xff] }
  0x1b   : > { %v1053_v27 = vpop.eup %1052 }
  0x1c   : > { %961 = vmatpush.xpose.msk.msra.mxu0 %vm291_vm0, %v284_v2  ;;  %v359_v28 = vmul.f32 8.0, %v1053_v27  ;;  %vm363_vm2 = vweird.f32 %v1053_v27 }
  0x1e   : > { %v360_v29 = vsub.f32 1.0, %v359_v28 }
  0x20   : > { %962 = vmatpush.xpose.msk.msra.mxu0 %vm291_vm0, %v283_v3  ;;  %v361_v30 = vmul.f32 %v1053_v27, %v360_v29 }
  0x22   : > { %v362_v31 = vadd.f32 %v1053_v27, %v361_v30 }
  0x24   : > { %963 = vmatpush.xpose.msk.msra.mxu0 %vm291_vm0, %v282_v4  ;;  %v1345_v32 = vsel %vm363_vm2, %v1053_v27, %v362_v31 }
  0x28   : > { %964 = vmatpush.xpose.msk.msra.mxu0 %vm291_vm0, %v281_v5 }
  0x2c   : > { %965 = vmatpush.xpose.msk.msra.mxu0 %vm291_vm0, %v280_v6 }
  0x30   : > { %966 = vmatpush.xpose.msk.msra.mxu0 %vm291_vm0, %v279_v7 }
  0x34   : > { %967 = vmatpush.xpose.msk.msra.mxu0 %vm291_vm0, %v278_v8 }
  0x38   : > { %968 = vmatpush.xpose.msk.msra.mxu0 %vm291_vm0, %v277_v9 }
  0x3c   : > { %969 = vmatpush.xpose.msk.msra.mxu0 %vm291_vm0, %v276_v10 }
  0x40   : > { %970 = vmatpush.xpose.msk.msra.mxu0 %vm291_vm0, %v275_v11 }
  0x43   : > { %971 = vmatmul.msk.f32.vlgmr.msra.gmra.mxu0 %vm291_vm0, %v274_v12 }
  0xc0   : > { %v348_v14 = vpop.f32.mrf.mxu0 }
  0xc1   : > { %v1311_v15 = vadd.f32 %v1048_v13, %v348_v14 }
  0xc3   : > { %v1315_v16 = vmul.f32 %v1311_v15, %v1311_v15 }
  0xc5   : > { %475 = vrot.lane.b32.xlu1 %v1315_v16, %s1150_s16  ;;  %384 = vrot.lane.b32.xlu0 %v1315_v16, %s1151_s17  ;;  %v355_v19 = vsel %vm354_vm1, %v1315_v16, 0.0 }
  0xcd   : > { %499 = vrot.lane.b32.xlu0 %v1315_v16, %s1152_s18 }
  0xd5   : > { %405 = vrot.lane.b32.xlu0 %v1326_v17, %s1153_s21 }
  0xdd   : > { %495 = vrot.lane.b32.xlu0 %v1332_v18, %s1154_s29 }
 0x107   : > { %356 = vadd.xlane.f32.xlu0 %v355_v19 }
 0x11b   : > { %703 = vrot.lane.b32.xlu0 %v1315_v16, %s1155_s8 }
 0x137   : > { %v385_v20 = vpop.permute.xlu0 %384  ;;  %v476_v24 = vpop.permute.xlu1 %475 }
 0x138   : > { %v387_v21 = vsel %vm354_vm1, %v385_v20, 0.0  ;;  %v478_v25 = vsel %vm354_vm1, %v476_v24, 0.0 }
 0x139   : > { %388 = vadd.xlane.f32.xlu1 %v387_v21 }
 0x13f   : > { %v500_v22 = vpop.permute.xlu0 %499 }
 0x140   : > { %v502_v23 = vsel %vm354_vm1, %v500_v22, 0.0 }
 0x141   : > { %503 = vadd.xlane.f32.xlu2 %v502_v23 }
 0x147   : > { %v406_v53 = vpop.permute.xlu0 %405 }
 0x149   : > { %479 = vadd.xlane.f32.xlu2 %v478_v25 }
 0x14f   : > { %v496_v7 = vpop.permute.xlu0 %495 }
 0x161   : > { %518 = vrot.lane.b32.xlu2 %v1326_v17, %s1156_s9 }
 0x17a   : > { %v357_v9 = vpop.xlane.xlu0 %356 }
 0x17b   : > { %v365_v10 = vmul.f32 %v1345_v32, %v357_v9 }
 0x17d   : > { %v366_v11 = vadd.f32 1.1920929e-07, %v365_v10 }
 0x17f   : > { %vm373_vm13 = vweird.f32 %v366_v11 }
 0x18d   : > { %v704_v29 = vpop.permute.xlu0 %703 }
 0x1ac   : > { %v389_v33 = vpop.xlane.xlu1 %388 }
 0x1ad   : > { %v390_v34 = vmul.f32 %v389_v33, %v1345_v32  ;;  %v706_v33 = vsel %vm354_vm1, %v704_v29, 0.0 }
 0x1af   : > { %v391_v35 = vadd.f32 1.1920929e-07, %v390_v34 }
 0x1b1   : > { %1054 = vrsqrt.f32 %v391_v35  ;;  %vm398_vm4 = vweird.f32 %v391_v35 }
 0x1b4   : > { %v504_v36 = vpop.xlane.xlu2 %503 }
 0x1b5   : > { %v505_v37 = vmul.f32 %v504_v36, %v1345_v32 }
 0x1b7   : > { %v1055_v38 = vpop.eup %1054  ;;  %v506_v39 = vadd.f32 1.1920929e-07, %v505_v37 }
 0x1b8   : > { %v393_v40 = vmul.f32 %v1055_v38, %v391_v35  ;;  %vm399_vm3 = vweird.f32 %v1055_v38 }
 0x1b9   : > { %1056 = vrsqrt.f32 %v506_v39  ;;  %vm400_vm5 = vmor %vm398_vm4, %vm399_vm3  ;;  %vm513_vm7 = vweird.f32 %v506_v39 }
 0x1ba   : > { %v394_v41 = vmul.f32 %v1055_v38, %v393_v40 }
 0x1bc   : > { %v395_v42 = vmul.f32 0.5, %v394_v41  ;;  %v480_v43 = vpop.xlane.xlu2 %479 }
 0x1bd   : > { %v481_v44 = vmul.f32 %v480_v43, %v1345_v32 }
 0x1be   : > { %v396_v45 = vsub.f32 1.5, %v395_v42 }
 0x1bf   : > { %v1057_v46 = vpop.eup %1056  ;;  %v482_v47 = vadd.f32 1.1920929e-07, %v481_v44 }
 0x1c0   : > { %v397_v48 = vmul.f32 %v1055_v38, %v396_v45  ;;  %v508_v49 = vmul.f32 %v1057_v46, %v506_v39  ;;  %vm514_vm6 = vweird.f32 %v1057_v46 }
 0x1c1   : > { %1058 = vrsqrt.f32 %v482_v47  ;;  %vm515_vm8 = vmor %vm513_vm7, %vm514_vm6  ;;  %vm489_vm10 = vweird.f32 %v482_v47 }
 0x1c2   : > { %v509_v50 = vmul.f32 %v1057_v46, %v508_v49  ;;  %v401_v51 = vsel %vm400_vm5, %v1055_v38, %v397_v48  ;;  %1060 = vrsqrt.f32 %v366_v11 }
 0x1c3   : > { %v402_v52 = vmul.f32 %v401_v51, %v1311_v15 }
 0x1c4   : > { %v510_v54 = vmul.f32 0.5, %v509_v50  ;;  %v519_v62 = vpop.permute.xlu2 %518 }
 0x1c5   : > { %v408_v55 = vmul.f32 %v406_v53, %v402_v52 }
 0x1c6   : > { %v511_v56 = vsub.f32 1.5, %v510_v54 }
 0x1c7   : > { %v1059_v57 = vpop.eup %1058  ;;  %410 = vrot.lane.b32.xlu2 %v408_v55, %s1151_s17  ;;  %s1162_s17 = smov 56  }
 0x1c8   : > { %v484_v58 = vmul.f32 %v1059_v57, %v482_v47  ;;  %v512_v59 = vmul.f32 %v1057_v46, %v511_v56  ;;  %vm490_vm9 = vweird.f32 %v1059_v57  ;;  %v1061_v12 = vpop.eup %1060 }
 0x1c9   : > { %vm491_vm11 = vmor %vm489_vm10, %vm490_vm9  ;;  %v368_v13 = vmul.f32 %v1061_v12, %v366_v11  ;;  %vm374_vm12 = vweird.f32 %v1061_v12 }
 0x1ca   : > { %v485_v60 = vmul.f32 %v1059_v57, %v484_v58  ;;  %v516_v61 = vsel %vm515_vm8, %v1057_v46, %v512_v59  ;;  %vm375_vm14 = vmor %vm373_vm13, %vm374_vm12  ;;  %vm830_vm13 = vcmask 130048  }
 0x1cb   : > { %v517_v63 = vmul.f32 %v516_v61, %v1311_v15  ;;  %v369_v14 = vmul.f32 %v1061_v12, %v368_v13 }
 0x1cc   : > { %v486_v0 = vmul.f32 0.5, %v485_v60 }
 0x1cd   : > { %v521_v1 = vmul.f32 %v519_v62, %v517_v63  ;;  %v370_v19 = vmul.f32 0.5, %v369_v14 }
 0x1ce   : > { %v487_v2 = vsub.f32 1.5, %v486_v0 }
 0x1cf   : > { %526 = vrot.lane.b32.xlu2 %v521_v1, %s1152_s18  ;;  %v371_v20 = vsub.f32 1.5, %v370_v19  ;;  %s1163_s18 = smov 16  }
 0x1d0   : > { %v488_v3 = vmul.f32 %v1059_v57, %v487_v2 }
 0x1d1   : > { %v372_v21 = vmul.f32 %v1061_v12, %v371_v20 }
 0x1d2   : > { %v492_v4 = vsel %vm491_vm11, %v1059_v57, %v488_v3 }
 0x1d3   : > { %v493_v5 = vmul.f32 0.35355338, %v492_v4  ;;  %v376_v22 = vsel %vm375_vm14, %v1061_v12, %v372_v21  ;;  %vm832_vm14 = vcmask 195584  }
 0x1d4   : > { %v377_v23 = vmul.f32 0.35355338, %v376_v22 }
 0x1d5   : > { %v494_v6 = vmul.f32 %v493_v5, %v1311_v15 }
 0x1d6   : > { %v378_v24 = vmul.f32 %v377_v23, %v1311_v15 }
 0x1d7   : > { %613 = vrot.lane.b32.xlu2 %v1315_v16, %s1158_s13  ;;  %v498_v8 = vmul.f32 %v496_v7, %v494_v6 }
 0x1d9   : > { %523 = vrot.lane.b32.xlu1 %v498_v8, %s1150_s16  ;;  %s1161_s16 = smov 48  }
 0x1df   : > { %589 = vrot.lane.b32.xlu2 %v1315_v16, %s1159_s14 }
 0x1e7   : > { %727 = vrot.lane.b32.xlu2 %v1315_v16, %s1160_s15  ;;  %v382_v16 = vmul.f32 %v1332_v18, %v378_v24 }
 0x221   : > { %v411_v25 = vpop.permute.xlu2 %410 }
 0x222   : > { %972 = vmatpush.xpose.msk.msra.mxu1 %vm354_vm1, %v411_v25 }
 0x225   : > { %973 = vmatmul.msk.f32.vlgmr.msra.gmra.mxu1 %vm354_vm1, %v382_v16 }
 0x229   : > { %v527_v26 = vpop.permute.xlu2 %526 }
 0x22a   : > { %975 = vmatpush.xpose.msk.msra.mxu3 %vm354_vm1, %v527_v26 }
 0x231   : > { %v614_v27 = vpop.permute.xlu2 %613 }
 0x232   : > { %v616_v28 = vsel %vm354_vm1, %v614_v27, 0.0 }
 0x233   : > { %617 = vadd.xlane.f32.xlu1 %v616_v28 }
 0x239   : > { %v590_v30 = vpop.permute.xlu2 %589 }
 0x23a   : > { %v592_v31 = vsel %vm354_vm1, %v590_v30, 0.0 }
 0x23b   : > { %593 = vadd.xlane.f32.xlu2 %v592_v31  ;;  %707 = vadd.xlane.f32.xlu1 %v706_v33 }
 0x241   : > { %v728_v34 = vpop.permute.xlu2 %727 }
 0x242   : > { %v730_v35 = vsel %vm354_vm1, %v728_v34, 0.0 }
 0x243   : > { %731 = vadd.xlane.f32.xlu0 %v730_v35 }
 0x24b   : > { %v524_v36 = vpop.permute.xlu1 %523 }
 0x24c   : > { %976 = vmatmul.msk.f32.vlgmr.msra.gmra.mxu3 %vm354_vm1, %v524_v36 }
 0x253   : > { %632 = vrot.lane.b32.xlu2 %v1326_v17, %s1161_s16 }
 0x254   : > { %746 = vrot.lane.b32.xlu1 %v1326_v17, %s1162_s17 }
 0x257   : > { %609 = vrot.lane.b32.xlu0 %v1332_v18, %s1163_s18 }
 0x25b   : > { %723 = vrot.lane.b32.xlu2 %v1332_v18, %s1164_s19 }
 0x25f   : > { %447 = vrot.lane.b32.xlu0 %v1311_v15, %s1165_s20 }
 0x267   : > { %561 = vrot.lane.b32.xlu0 %v1311_v15, %s1162_s17  ;;  %s990_s17 = sshll.u32 %s1227_s28, 3 }
 0x268   : > { %s889_s20 = scalar_lea.hbm %s1482_s7, %s990_s17 }
 0x2a2   : > { %v1382_v37 = vpop.f32.mrf.mxu1 }
 0x2a3   : > { %v437_v38 = vsel %vm354_vm1, %v1382_v37, -inf }
 0x2a4   : > { %438 = vmax.xlane.f32.xlu1 %v437_v38 }
 0x2a6   : > { %v618_v17 = vpop.xlane.xlu1 %617 }
 0x2a7   : > { %v619_v39 = vmul.f32 %v618_v17, %v1345_v32 }
 0x2a9   : > { %v620_v40 = vadd.f32 1.1920929e-07, %v619_v39 }
 0x2ab   : > { %1062 = vrsqrt.f32 %v620_v40  ;;  %vm627_vm2 = vweird.f32 %v620_v40 }
 0x2ae   : > { %v594_v41 = vpop.xlane.xlu2 %593  ;;  %v708_v42 = vpop.xlane.xlu1 %707 }
 0x2af   : > { %v595_v18 = vmul.f32 %v594_v41, %v1345_v32  ;;  %v709_v43 = vmul.f32 %v708_v42, %v1345_v32 }
 0x2b1   : > { %v1063_v44 = vpop.eup %1062  ;;  %v596_v45 = vadd.f32 1.1920929e-07, %v595_v18  ;;  %v710_v46 = vadd.f32 1.1920929e-07, %v709_v43 }
 0x2b2   : > { %v622_v47 = vmul.f32 %v1063_v44, %v620_v40  ;;  %vm628_vm15 = vweird.f32 %v1063_v44 }
 0x2b3   : > { %1064 = vrsqrt.f32 %v596_v45  ;;  %vm629_vm3 = vmor %vm627_vm2, %vm628_vm15  ;;  %vm717_vm5 = vweird.f32 %v710_v46  ;;  %vm603_vm9 = vweird.f32 %v596_v45 }
 0x2b4   : > { %v623_v48 = vmul.f32 %v1063_v44, %v622_v47  ;;  %1066 = vrsqrt.f32 %v710_v46 }
 0x2b6   : > { %v624_v49 = vmul.f32 0.5, %v623_v48  ;;  %v732_v50 = vpop.xlane.xlu0 %731  ;;  %v633_v60 = vpop.permute.xlu2 %632 }
 0x2b7   : > { %v733_v51 = vmul.f32 %v732_v50, %v1345_v32 }
 0x2b8   : > { %v625_v52 = vsub.f32 1.5, %v624_v49 }
 0x2b9   : > { %v1065_v53 = vpop.eup %1064  ;;  %v734_v54 = vadd.f32 1.1920929e-07, %v733_v51 }
 0x2ba   : > { %v1067_v55 = vpop.eup %1066  ;;  %v598_v56 = vmul.f32 %v1065_v53, %v596_v45  ;;  %v626_v57 = vmul.f32 %v1063_v44, %v625_v52  ;;  %vm604_vm7 = vweird.f32 %v1065_v53 }
 0x2bb   : > { %v712_v58 = vmul.f32 %v1067_v55, %v710_v46  ;;  %1068 = vrsqrt.f32 %v734_v54  ;;  %vm718_vm4 = vweird.f32 %v1067_v55  ;;  %vm605_vm10 = vmor %vm603_vm9, %vm604_vm7  ;;  %vm741_vm11 = vweird.f32 %v734_v54 }
 0x2bc   : > { %v599_v59 = vmul.f32 %v1065_v53, %v598_v56  ;;  %v630_v61 = vsel %vm629_vm3, %v1063_v44, %v626_v57  ;;  %vm719_vm6 = vmor %vm717_vm5, %vm718_vm4 }
 0x2bd   : > { %v713_v62 = vmul.f32 %v1067_v55, %v712_v58  ;;  %v631_v63 = vmul.f32 %v630_v61, %v1311_v15 }
 0x2be   : > { %v600_v32 = vmul.f32 0.5, %v599_v59  ;;  %v724_v11 = vpop.permute.xlu2 %723 }
 0x2bf   : > { %v714_v0 = vmul.f32 0.5, %v713_v62  ;;  %v635_v1 = vmul.f32 %v633_v60, %v631_v63 }
 0x2c0   : > { %v601_v6 = vsub.f32 1.5, %v600_v32 }
 0x2c1   : > { %v1069_v2 = vpop.eup %1068  ;;  %v715_v3 = vsub.f32 1.5, %v714_v0  ;;  %640 = vrot.lane.b32.xlu0 %v635_v1, %s1158_s13 }
 0x2c2   : > { %v736_v4 = vmul.f32 %v1069_v2, %v734_v54  ;;  %v602_v14 = vmul.f32 %v1065_v53, %v601_v6  ;;  %vm742_vm8 = vweird.f32 %v1069_v2 }
 0x2c3   : > { %v716_v5 = vmul.f32 %v1067_v55, %v715_v3  ;;  %vm743_vm12 = vmor %vm741_vm11, %vm742_vm8 }
 0x2c4   : > { %v737_v7 = vmul.f32 %v1069_v2, %v736_v4  ;;  %v606_v22 = vsel %vm605_vm10, %v1065_v53, %v602_v14 }
 0x2c5   : > { %v720_v8 = vsel %vm719_vm6, %v1067_v55, %v716_v5  ;;  %v607_v16 = vmul.f32 0.35355338, %v606_v22 }
 0x2c6   : > { %v738_v9 = vmul.f32 0.5, %v737_v7  ;;  %v721_v10 = vmul.f32 0.35355338, %v720_v8  ;;  %v747_v23 = vpop.permute.xlu1 %746 }
 0x2c7   : > { %v608_v30 = vmul.f32 %v607_v16, %v1311_v15  ;;  %v1051_v16 = vld [vmem:[%s1481_s6] ss:$0 sm:$0xff] }
 0x2c8   : > { %v739_v12 = vsub.f32 1.5, %v738_v9  ;;  %v722_v13 = vmul.f32 %v721_v10, %v1311_v15  ;;  %v836_v10 = vld [vmem:[%s1480_s5 + $0x10] sm:$0xff] }
 0x2c9   : > { %v610_v19 = vpop.permute.xlu0 %609 }
 0x2ca   : > { %v726_v20 = vmul.f32 %v724_v11, %v722_v13  ;;  %v740_v21 = vmul.f32 %v1069_v2, %v739_v12  ;;  %v612_v31 = vmul.f32 %v610_v19, %v608_v30  ;;  %v835_v11 = vld [vmem:[%s1480_s5 + $0x8] sm:$0xff]  ;;  %v834_v12 = vld [vmem:[%s1480_s5] sm:$0xff] }
 0x2cc   : > { %751 = vrot.lane.b32.xlu1 %v726_v20, %s1155_s8  ;;  %v744_v24 = vsel %vm743_vm12, %v1069_v2, %v740_v21  ;;  %v837_v2 = vld [vmem:[%s1480_s5 + $0x18] sm:$0xff]  ;;  %s893_s8 = sshll.u32 %s889_s20, 4  ;;  %s894_s8 = int_to_ptr.hbm [resolvable:$true] %s893_s8 }
 0x2cd   : > { %v745_v25 = vmul.f32 %v744_v24, %v1311_v15  ;;  %s1100_s28 = sshra.s32 %s894_s8, 4  ;;  %s1101_s28 = int_to_ptr.hbm [resolvable:$true] %s1100_s28 }
 0x2ce   : > { %s1102_s13 = scalar_lea.hbm %s1101_s28, 8  ;;  %p1107_p0 = scmp.lt.s32.totalorder %s1101_s28, %s1482_s7 }
 0x2cf   : > { %v749_v26 = vmul.f32 %v747_v23, %v745_v25  ;;  %v549_v27 = vpop.f32.mrf.mxu3  ;;  %p1103_p11 = scmp.ne.s32.totalorder %s1101_s28, %s1102_s13 }
 0x2d0   : > { %v552_v28 = vsel %vm354_vm1, %v549_v27, -inf }
 0x2d1   : > { %553 = vmax.xlane.f32.xlu2 %v552_v28  ;;  %754 = vrot.lane.b32.xlu0 %v749_v26, %s1160_s15  ;;  %v448_v29 = vpop.permute.xlu0 %447  ;;  %s267_s15 = sand.u32 1, %s1140_s25   ;;  %p1104_p12 = pnand %p1103_p11, %p1244_p5 }
 0x2d2   : > { %468 = vmatpush.msra.mxu2 %v448_v29 }
 0x2d3   : > { %p1105_p13 = pneg %p1104_p12 }
 0x2d4   : > { %789 = vrot.lane.b32.xlu1 %v1311_v15, %s1156_s9  ;;  %s879_s9 = scalar_lea.sflag [#allocation3], %s267_s15 }
 0x2d9   : > { %637 = vrot.lane.b32.xlu0 %v612_v31, %s1159_s14  ;;  %v562_v33 = vpop.permute.xlu0 %561 }
 0x2da   : > { %582 = vmatpush.msrb.mxu2 %v562_v33 }
 0x317   : > { %v439_v34 = vpop.xlane.xlu1 %438 }
 0x318   : > { %v440_v35 = vsub.f32 %v1382_v37, %v439_v34 }
 0x31a   : > { %v441_v36 = vmul.f32 1.442695, %v440_v35 }
 0x31c   : > { %1070 = vpow2.f32 %v441_v36 }
 0x322   : > { %v1071_v38 = vpop.eup %1070 }
 0x323   : > { %974 = vmatmul.msk.f32.vlgmr.msra.gmra.mxu2 %vm354_vm1, %v1071_v38  ;;  %v443_v62 = vsel %vm354_vm1, %v1071_v38, 0.0 }
 0x333   : > { %v641_v17 = vpop.permute.xlu0 %640 }
 0x334   : > { %978 = vmatpush.xpose.msk.msrb.mxu1 %vm354_vm1, %v641_v17 }
 0x33e   : > { %v752_v39 = vpop.permute.xlu1 %751 }
 0x343   : > { %v755_v40 = vpop.permute.xlu0 %754 }
 0x344   : > { %v554_v41 = vpop.xlane.xlu2 %553  ;;  %981 = vmatpush.xpose.msk.msra.mxu2 %vm354_vm1, %v755_v40 }
 0x345   : > { %v555_v42 = vsub.f32 %v549_v27, %v554_v41 }
 0x346   : > { %v790_v18 = vpop.permute.xlu1 %789 }
 0x347   : > { %v556_v43 = vmul.f32 1.442695, %v555_v42  ;;  %810 = vmatpush.msra.mxu1 %v790_v18 }
 0x349   : > { %1072 = vpow2.f32 %v556_v43 }
 0x34b   : > { %v638_v44 = vpop.permute.xlu0 %637 }
 0x34c   : > { %979 = vmatmul.msk.f32.vlgmr.msrb.gmra.mxu1 %vm354_vm1, %v638_v44 }
 0x34f   : > { %v1073_v37 = vpop.eup %1072 }
 0x350   : > { %977 = vmatmul.msk.f32.vlgmr.msrb.gmra.mxu2 %vm354_vm1, %v1073_v37  ;;  %v558_v45 = vsel %vm354_vm1, %v1073_v37, 0.0 }
 0x351   : > { %559 = vadd.xlane.f32.xlu1 %v558_v45 }
 0x358   : > { %982 = vmatmul.msk.f32.vlgmr.msra.gmra.mxu2 %vm354_vm1, %v752_v39 }
 0x3a6   : > { %v470_v48 = vpop.f32.mrf.mxu2 }
 0x3c4   : > { %v560_v63 = vpop.xlane.xlu1 %559 }
 0x3c9   : > { %v663_v46 = vpop.f32.mrf.mxu1 }
 0x3ca   : > { %v666_v47 = vsel %vm354_vm1, %v663_v46, -inf }
 0x3cb   : > { %667 = vmax.xlane.f32.xlu2 %v666_v47 }
 0x3d3   : > { %v584_v49 = vpop.f32.mrf.mxu2 }
 0x3db   : > { %v777_v50 = vpop.f32.mrf.mxu2 }
 0x3dc   : > { %v780_v51 = vsel %vm354_vm1, %v777_v50, -inf }
 0x3dd   : > { %781 = vmax.xlane.f32.xlu0 %v780_v51 }
 0x3e3   : > { %675 = vrot.lane.b32.xlu2 %v1311_v15, %s1161_s16  ;;  %s957_s16 = sshll.u32 %s267_s15, 3 }
 0x3e4   : > { %s269_s23 = scalar_lea.vmem [#allocation2], %s957_s16  ;;  %s1106_s16 = scalar_lea.hbm %s1482_s7, 16 }
 0x3e5   : > { %p1108_p1 = scmp.lt.s32.totalorder %s1106_s16, %s1102_s13 }
 0x3e7   : > { %p1109_p2 = por %p1108_p1, %p1107_p0 }
 0x3e9   : > { %p1110_p3 = pnand %p1109_p2, %p1105_p13 }
 0x43e   : > { %v668_v52 = vpop.xlane.xlu2 %667 }
 0x43f   : > { %v669_v53 = vsub.f32 %v663_v46, %v668_v52 }
 0x441   : > { %v670_v54 = vmul.f32 1.442695, %v669_v53 }
 0x443   : > { %1074 = vpow2.f32 %v670_v54 }
 0x446   : > { %v676_v55 = vpop.permute.xlu2 %675 }
 0x447   : > { %696 = vmatpush.msrb.mxu3 %v676_v55 }
 0x449   : > { %v1075_v56 = vpop.eup %1074  ;;  %984 = vmatpush.xpose.msk.msra.mxu3 %vm291_vm0, %v837_v2 }
 0x44a   : > { %980 = vmatmul.msk.f32.vlgmr.msrb.gmra.mxu3 %vm354_vm1, %v1075_v56  ;;  %v672_v57 = vsel %vm354_vm1, %v1075_v56, 0.0 }
 0x44b   : > { %673 = vadd.xlane.f32.xlu2 %v672_v57 }
 0x44d   : > { %985 = vmatpush.xpose.msk.msra.mxu3 %vm291_vm0, %v836_v10 }
 0x450   : > { %v782_v58 = vpop.xlane.xlu0 %781 }
 0x451   : > { %v783_v59 = vsub.f32 %v777_v50, %v782_v58  ;;  %986 = vmatpush.xpose.msk.msra.mxu3 %vm291_vm0, %v835_v11 }
 0x453   : > { %v784_v60 = vmul.f32 1.442695, %v783_v59 }
 0x455   : > { %1076 = vpow2.f32 %v784_v60  ;;  %987 = vmatpush.xpose.msk.msra.mxu3 %vm291_vm0, %v834_v12 }
 0x456   : > { %1078 = vrcp.f32 %v560_v63 }
 0x45b   : > { %v1077_v61 = vpop.eup %1076 }
 0x45c   : > { %983 = vmatmul.msk.f32.vlgmr.msra.gmra.mxu1 %vm354_vm1, %v1077_v61  ;;  %v786_v15 = vsel %vm354_vm1, %v1077_v61, 0.0  ;;  %v1079_v0 = vpop.eup %1078 }
 0x45d   : > { %787 = vadd.xlane.f32.xlu0 %v786_v15  ;;  %v588_v1 = vmul.f32 %v1079_v0, %v584_v49 }
 0x465   : > { %444 = vadd.xlane.f32.xlu0 %v443_v62 }
 0x479   : > { %818 = vrot.lane.b32.xlu0 %v588_v1, %s1154_s29  ;;  %s891_s29 = sshll.u32 %s269_s23, 4  ;;  %s892_s29 = int_to_ptr.vmem [resolvable:$true] %s891_s29 }
 0x4be   : > { %v674_v32 = vpop.xlane.xlu2 %673 }
 0x4bf   : > { %1080 = vrcp.f32 %v674_v32 }
 0x4c5   : > { %v1081_v3 = vpop.eup %1080 }
 0x4cd   : > { %v698_v4 = vpop.f32.mrf.mxu3 }
 0x4ce   : > { %v702_v5 = vmul.f32 %v1081_v3, %v698_v4 }
 0x4d0   : > { %822 = vrot.lane.b32.xlu1 %v702_v5, %s1163_s18  ;;  %v788_v6 = vpop.xlane.xlu0 %787 }
 0x4d1   : > { %1082 = vrcp.f32 %v788_v6 }
 0x4d7   : > { %v1083_v7 = vpop.eup %1082 }
 0x4d8   : > { %v445_v13 = vpop.xlane.xlu0 %444 }
 0x4d9   : > { %v812_v8 = vpop.f32.mrf.mxu1  ;;  %1084 = vrcp.f32 %v445_v13 }
 0x4da   : > { %v816_v9 = vmul.f32 %v1083_v7, %v812_v8 }
 0x4dc   : > { %826 = vrot.lane.b32.xlu2 %v816_v9, %s1164_s19 }
 0x4df   : > { %v1085_v14 = vpop.eup %1084 }
 0x4e0   : > { %v474_v20 = vmul.f32 %v1085_v14, %v470_v48 }
 0x4eb   : > { %v819_v19 = vpop.permute.xlu0 %818 }
 0x4ec   : > { %v829_v21 = vsel %vm354_vm1, %v474_v20, %v819_v19 }
 0x536   : > { %v827_v23 = vpop.permute.xlu2 %826 }
 0x542   : > { %v823_v22 = vpop.permute.xlu1 %822 }
 0x543   : > { %v831_v24 = vsel %vm830_vm13, %v829_v21, %v823_v22 }
 0x544   : > { %v833_v25 = vsel %vm832_vm14, %v831_v24, %v827_v23 }
 0x545   : > { %988 = vmatmul.msk.f32.vlgmr.msra.gmra.mxu3 %vm291_vm0, %v833_v25 }
 0x5c8   : > { %v874_v26 = vpop.f32.mrf.mxu3 }
 0x5c9   : > { %v875_v27 = vadd.f32 %v1051_v16, %v874_v26 }
 0x5cb   : > { %877 = vst.msk [vmem:[%s269_s23] sm:$0xff] %vm291_vm0, %v875_v27 }
 0x5cc   : > { %1113 = shalt.err (!%p1110_p3)
}
 0x5cd   : > { %993 = dma.vmem_to_hbm [thread:$0]  (%p1244_p5), %s892_s29, 128, %s894_s8, %s879_s9  }
 0x5ce PF: > { %p999_p4 = scmp.ge.s32.totalorder %s1148_s27, 2  ;;  %s905_s15 = sand.u32 1, %s1136_s24  }
 0x5cf   : > { %s906_s20 = scalar_lea.sflag [#allocation3], %s905_s15 }
 0x5d0   : > { %p996_p7 = pnand %p999_p4, %p1248_p6 }
 0x5d2   : > { %p997_p8 = pneg %p996_p7 }
 0x5d4   : > { %1131 = dma.done.wait (%p997_p8), %s906_s20, 128  }
 0x5d5   : > { %1133 = vsyncadd (%p997_p8), %s906_s20, 4294967168  ;;  %p17_p9 = scmp.ge.s32.totalorder %s1231_s30, 4   ;;  %s1485_s24 = smov %s1140_s25 }
 0x5d6   : > { %s1486_s25 = smov %s1144_s26  ;;  %s1487_s26 = smov %s1242_s10 }
 0x5d7   : > { %s1488_s27 = smov %s1231_s30  ;;  %19 = sbr.rel (!%p17_p9) target bundleno = 3 (0x3), region = 83 }
 0x5dc   :  { %912 = vsyncpa [#allocation3], 1 }
 0x5dd   :  { %914 = vsyncpa [#allocation3 + $0x1], 1 }

</bundles_post_ra>
